<compile_context>
chip_gen: v5e
topology: v5e:2x2
jax: 0.10.0
libtpu: 0.0.40
codegen_flags: <defaults>
</compile_context>

<pallas_src>
import functools

import jax
import jax.numpy as jnp
from jax import lax
from jax.experimental import pallas as pl
from jax.experimental.pallas import tpu as pltpu

LANES = 128
MAX_BLOCK_ROWS = 2048   # 2048 * 128 * 4 B = 1 MiB per input per block
MAX_SUB_ROWS = 256      # in-kernel chunk size; bounds temporaries to ~128 KiB
EPS = 1e-6


def _round_up(x, m):
    return ((x + m - 1) // m) * m


def _pow_pos(base, log_base, gamma):
    """base ** gamma for strictly positive base.

    Integer gamma (including the default 2.0) -> repeated VPU multiplies.
    Non-integer gamma -> exp(gamma * log(base)) on the EUP.
    """
    g = float(gamma)
    if g.is_integer() and 0.0 <= g <= 8.0:
        n = int(g)
        if n == 0:
            return jnp.ones_like(base)
        r = base
        for _ in range(n - 1):
            r = r * base
        return r
    return jnp.exp(g * log_base)


def _fold_rows_to_8(v):
    """(R, 128) -> (8, 128) by summing groups of 8 rows (pure vreg adds)."""
    r = v.shape[0]
    if r == 8:
        return v
    acc = v[0:8, :]
    for j in range(1, r // 8):
        acc = acc + v[j * 8:(j + 1) * 8, :]
    return acc


def _focal_partials_kernel(*refs, gamma, alpha, sub_rows, has_weight,
                           last_idx, n_valid_last):
    """Per grid step: write an (8, 128) partial sum of the focal loss."""
    if has_weight:
        x_ref, t_ref, w_ref, o_ref = refs
    else:
        x_ref, t_ref, o_ref = refs
        w_ref = None

    blk_r = x_ref.shape[0]
    i = pl.program_id(0)
    alpha = float(alpha)

    acc = None
    for c in range(blk_r // sub_rows):
        sl = slice(c * sub_rows, (c + 1) * sub_rows)

        x = jnp.clip(x_ref[sl, :].astype(jnp.float32), EPS, 1.0 - EPS)
        t = t_ref[sl, :].astype(jnp.float32)

        one_minus_x = 1.0 - x
        log_x = jnp.log(x)
        log_omx = jnp.log(one_minus_x)
        pow_omx = _pow_pos(one_minus_x, log_omx, gamma)
        pow_x = _pow_pos(x, log_x, gamma)

        loss = (-alpha) * t * pow_omx * log_x \
            - (1.0 - alpha) * (1.0 - t) * pow_x * log_omx

        if w_ref is not None:
            # Padded weights are exactly zero -> padded loss is exactly zero.
            loss = loss * w_ref[sl, :].astype(jnp.float32)
        elif n_valid_last is not None:
            # Ragged no-weight case only: mask the padded tail.  Only the
            # last grid block can contain padding.
            r_it = lax.broadcasted_iota(jnp.int32, (sub_rows, LANES), 0)
            c_it = lax.broadcasted_iota(jnp.int32, (sub_rows, LANES), 1)
            local_flat = (c * sub_rows + r_it) * LANES + c_it
            keep = jnp.logical_or(i != last_idx, local_flat < n_valid_last)
            loss = jnp.where(keep, loss, 0.0)

        part = _fold_rows_to_8(loss)
        acc = part if acc is None else acc + part

    o_ref[...] = acc


def binary_focal_loss(inp, target, weight=None, *,
                      gamma=2.0, alpha=0.25, size_average=True):
    """Pallas TPU implementation of BinaryFocalLoss.forward."""
    assert inp.shape == target.shape
    if weight is not None:
        assert weight.shape == inp.shape

    n_valid = int(inp.size)

    # --- tiling -------------------------------------------------------------
    rows = pl.cdiv(n_valid, LANES)
    rows8 = _round_up(rows, 8)
    blk_r = min(MAX_BLOCK_ROWS, rows8)
    rows_padded = _round_up(rows8, blk_r)
    grid_n = rows_padded // blk_r
    n_pad = rows_padded * LANES - n_valid

    # Largest multiple-of-8 divisor of blk_r that is <= MAX_SUB_ROWS.
    sub_rows = 8
    for cand in range(MAX_SUB_ROWS, 7, -8):
        if blk_r % cand == 0:
            sub_rows = cand
            break

    # --- input prep (no dtype copies; pad only if ragged) --------------------
    def prep(a):
        a = a.reshape(-1)
        if n_pad:
            a = jnp.pad(a, (0, n_pad))  # zeros
        return a.reshape(rows_padded, LANES)

    x2 = prep(inp)
    t2 = prep(target)

    block_spec = lambda: pl.BlockSpec((blk_r, LANES), lambda i: (i, 0))
    in_specs = [block_spec(), block_spec()]
    args = [x2, t2]

    has_weight = weight is not None
    if has_weight:
        in_specs.append(block_spec())
        args.append(prep(weight))      # pads with exact zeros
        n_valid_last = None
    else:
        n_valid_last = None
        if n_pad:
            n_valid_last = n_valid - (grid_n - 1) * blk_r * LANES

    kernel = functools.partial(
        _focal_partials_kernel,
        gamma=float(gamma),
        alpha=float(alpha),
        sub_rows=sub_rows,
        has_weight=has_weight,
        last_idx=grid_n - 1,
        n_valid_last=n_valid_last,
    )

    partials = pl.pallas_call(
        kernel,
        out_shape=jax.ShapeDtypeStruct((grid_n * 8, LANES), jnp.float32),
        grid_spec=pltpu.PrefetchScalarGridSpec(
            num_scalar_prefetch=0,
            grid=(grid_n,),
            in_specs=in_specs,
            out_specs=pl.BlockSpec((8, LANES), lambda i: (i, 0)),
        ),
        compiler_params=pltpu.CompilerParams(
            dimension_semantics=("parallel",)),
    )(*args)

    total = jnp.sum(partials)
    if size_average:
        total = total / n_valid
    return total


def _reference(inp, target, weight=None, gamma=2.0, alpha=0.25,
               size_average=True):
    x = jnp.clip(inp.astype(jnp.float32), EPS, 1.0 - EPS)
    t = target.astype(jnp.float32)
    loss = (-alpha * t * (1.0 - x) ** gamma * jnp.log(x)
            - (1.0 - alpha) * (1.0 - t) * x ** gamma * jnp.log(1.0 - x))
    if weight is not None:
        loss = loss * weight
    total = jnp.sum(loss)
    if size_average:
        total = total / inp.size
    return total


if __name__ == "__main__":
    key = jax.random.PRNGKey(0)
    k1, k2, k3 = jax.random.split(key, 3)

    # NCHW-shaped probabilities / binary targets, like the PyTorch module.
    shape = (2, 4, 16, 16)
    inp = jax.random.uniform(k1, shape, dtype=jnp.float32)
    target = (jax.random.uniform(k2, shape) > 0.5).astype(jnp.float32)
    weight = jax.random.uniform(k3, shape, dtype=jnp.float32)

    # No-weight path (specialized 2-input kernel).
    loss = jax.block_until_ready(binary_focal_loss(inp, target))
    ref = _reference(inp, target)
    assert jnp.allclose(loss, ref, rtol=1e-5, atol=1e-6), (loss, ref)

    # Weighted path.
    loss_w = jax.block_until_ready(binary_focal_loss(inp, target, weight))
    ref_w = _reference(inp, target, weight)
    assert jnp.allclose(loss_w, ref_w, rtol=1e-5, atol=1e-6), (loss_w, ref_w)

    # Ragged size (exercises in-kernel tail mask) + non-integer gamma
    # (exercises the exp/log power path) + size_average=False.
    shape2 = (3, 5, 7, 11)
    i2 = jax.random.uniform(k1, shape2, dtype=jnp.float32)
    t2 = (jax.random.uniform(k2, shape2) > 0.5).astype(jnp.float32)
    loss2 = jax.block_until_ready(
        binary_focal_loss(i2, t2, gamma=1.5, size_average=False))
    ref2 = _reference(i2, t2, gamma=1.5, size_average=False)
    assert jnp.allclose(loss2, ref2, rtol=1e-4, atol=1e-5), (loss2, ref2)

    print("KERNEL_OK")
</pallas_src>

<mosaic_0001>
module attributes {stable_mosaic.version = 11 : i64} {
  func.func @_focal_partials_kernel(%arg0: i32, %arg1: memref<16x128xf32, #tpu.memory_space<vmem>>, %arg2: memref<16x128xf32, #tpu.memory_space<vmem>>, %arg3: memref<8x128xf32, #tpu.memory_space<vmem>>) attributes {dimension_semantics = [#tpu.dimension_semantics<parallel>], iteration_bounds = array<i64: 1>, scalar_prefetch = 0 : i64, scratch_operands = 0 : i64, tpu.core_type = #tpu.core_type<tc>, window_params = [{transform_indices = @transform_0, window_bounds = array<i64: 16, 128>}, {transform_indices = @transform_1, window_bounds = array<i64: 16, 128>}, {transform_indices = @transform_2, window_bounds = array<i64: 8, 128>}]} {
    %c0 = arith.constant 0 : index
    %c0_0 = arith.constant 0 : index
    %0 = vector.load %arg1[%c0, %c0_0] : memref<16x128xf32, #tpu.memory_space<vmem>>, vector<16x128xf32>
    %cst = arith.constant 9.99999997E-7 : f32
    %cst_1 = arith.constant 0.999998986 : f32
    %1 = vector.broadcast %cst : f32 to vector<16x128xf32>
    %2 = arith.maximumf %1, %0 : vector<16x128xf32>
    %3 = vector.broadcast %cst_1 : f32 to vector<16x128xf32>
    %4 = arith.minimumf %3, %2 : vector<16x128xf32>
    %c0_2 = arith.constant 0 : index
    %c0_3 = arith.constant 0 : index
    %5 = vector.load %arg2[%c0_2, %c0_3] : memref<16x128xf32, #tpu.memory_space<vmem>>, vector<16x128xf32>
    %cst_4 = arith.constant 1.000000e+00 : f32
    %6 = vector.broadcast %cst_4 : f32 to vector<16x128xf32>
    %7 = arith.subf %6, %4 : vector<16x128xf32>
    %8 = math.log %4 : vector<16x128xf32>
    %9 = math.log %7 : vector<16x128xf32>
    %10 = arith.mulf %7, %7 : vector<16x128xf32>
    %11 = arith.mulf %4, %4 : vector<16x128xf32>
    %cst_5 = arith.constant -2.500000e-01 : f32
    %12 = vector.broadcast %cst_5 : f32 to vector<16x128xf32>
    %13 = arith.mulf %12, %5 : vector<16x128xf32>
    %14 = arith.mulf %13, %10 : vector<16x128xf32>
    %15 = arith.mulf %14, %8 : vector<16x128xf32>
    %cst_6 = arith.constant 1.000000e+00 : f32
    %16 = vector.broadcast %cst_6 : f32 to vector<16x128xf32>
    %17 = arith.subf %16, %5 : vector<16x128xf32>
    %cst_7 = arith.constant 7.500000e-01 : f32
    %18 = vector.broadcast %cst_7 : f32 to vector<16x128xf32>
    %19 = arith.mulf %18, %17 : vector<16x128xf32>
    %20 = arith.mulf %19, %11 : vector<16x128xf32>
    %21 = arith.mulf %20, %9 : vector<16x128xf32>
    %22 = arith.subf %15, %21 : vector<16x128xf32>
    %23 = vector.extract_strided_slice %22 {offsets = [0, 0], sizes = [8, 128], strides = [1, 1]} : vector<16x128xf32> to vector<8x128xf32>
    %24 = vector.extract_strided_slice %22 {offsets = [8, 0], sizes = [8, 128], strides = [1, 1]} : vector<16x128xf32> to vector<8x128xf32>
    %25 = arith.addf %23, %24 : vector<8x128xf32>
    %c0_8 = arith.constant 0 : index
    %c0_9 = arith.constant 0 : index
    %26 = vector.load %arg3[%c0_8, %c0_9] : memref<8x128xf32, #tpu.memory_space<vmem>>, vector<8x128xf32>
    tpu.vector_store %arg3[%c0_8, %c0_9], %25 {strides = array<i32>} : memref<8x128xf32, #tpu.memory_space<vmem>>, vector<8x128xf32>,
    return
  }
  func.func @transform_0(%arg0: i32) -> (i32, i32) {
    %c0_i32 = arith.constant 0 : i32
    %c0_i32_0 = arith.constant 0 : i32
    return %arg0, %c0_i32 : i32, i32
  }
  func.func @transform_1(%arg0: i32) -> (i32, i32) {
    %c0_i32 = arith.constant 0 : i32
    %c0_i32_0 = arith.constant 0 : i32
    return %arg0, %c0_i32 : i32, i32
  }
  func.func @transform_2(%arg0: i32) -> (i32, i32) {
    %c0_i32 = arith.constant 0 : i32
    %c0_i32_0 = arith.constant 0 : i32
    return %arg0, %c0_i32 : i32, i32
  }
}

</mosaic_0001>

<bundles_post_ra>
// kernel: tpu_custom_call.1
= control target key start
LH: loop header
LB: loop body
LE: loop exit
PB: predicated region body
PF: predicated region fallthrough
CT: control target
= control target key end

     0   :  { %7 = vsyncpa [#allocation3], 0  ;;  %s222_s0 = inlined_call_operand.hbm [shape: f32[16,128], index: 0, kind: input, shape index: {}]   ;;  %s223_s1 = inlined_call_operand.hbm [shape: f32[16,128], index: 1, kind: input, shape index: {}]   ;;  %s224_s2 = inlined_call_operand.hbm [shape: f32[8,128], index: 2, kind: output, shape index: {}]  }
   0x1   :  { %8 = vsyncpa [#allocation6], 0 }
   0x2   :  { %9 = vsyncpa [#allocation4], 0  ;;  %s14_s11 = sshll.u32 %s222_s0, 4  ;;  %s193_s12 = smov [#allocation2]   ;;  %s15_s11 = int_to_ptr.hbm [resolvable:$true] %s14_s11 }
   0x3   :  { %s16_s13 = sshll.u32 %s193_s12, 4  ;;  %s27_s16 = sshll.u32 %s223_s1, 4  ;;  %s17_s13 = int_to_ptr.vmem [resolvable:$true] %s16_s13  ;;  %s28_s16 = int_to_ptr.hbm [resolvable:$true] %s27_s16 }
   0x4   :  { %s194_s17 = smov 128   ;;  %s195_s18 = smov 8  }
   0x5   :  { %22 = dma.hbm_to_vmem [thread:$0]  %s15_s11, 256, %s17_s13, [#allocation3], %s194_s17, %s194_s17, %s195_s18  }
   0x6   :  { %s196_s19 = smov [#allocation5]  }
   0x7   :  { %s29_s20 = sshll.u32 %s196_s19, 4  ;;  %s30_s20 = int_to_ptr.vmem [resolvable:$true] %s29_s20 }
   0x8   :  { %35 = dma.hbm_to_vmem [thread:$0]  %s28_s16, 256, %s30_s20, [#allocation6], %s194_s17, %s194_s17, %s195_s18  }
   0x9   :  { %187 = dma.done.wait [#allocation3], 256  }
   0xa   :  { %188 = vsyncadd [#allocation3], 4294967040 }
   0xb   :  { %189 = dma.done.wait [#allocation6], 256  }
   0xc   :  { %190 = vsyncadd [#allocation6], 4294967040  ;;  %v44_v0 = vld [vmem:[#allocation2] sm:$0xff]  ;;  %v45_v1 = vld [vmem:[#allocation2 + $0x8] sm:$0xff]  ;;  %s197_s0 = smov [#allocation7]   ;;  %s91_s23 = sshll.u32 %s224_s2, 4  ;;  %s92_s23 = int_to_ptr.hbm [resolvable:$true] %s91_s23 }
   0xd   :  { %v46_v2 = vmax.f32 %v44_v0, 1e-06  ;;  %v47_v3 = vmax.f32 %v45_v1, 1e-06  ;;  %v50_v4 = vld [vmem:[#allocation5] sm:$0xff]  ;;  %v51_v5 = vld [vmem:[#allocation5 + $0x8] sm:$0xff] }
   0xe   :  { %v72_v8 = vsub.f32 1.0, %v50_v4  ;;  %v73_v11 = vsub.f32 1.0, %v51_v5  ;;  %v66_v12 = vmul.f32 -0.25, %v50_v4  ;;  %v67_v15 = vmul.f32 -0.25, %v51_v5  ;;  %s89_s1 = sshll.u32 %s197_s0, 4  ;;  %s90_s1 = int_to_ptr.vmem [resolvable:$true] %s89_s1 }
   0xf   :  { %v48_v6 = vmin.f32 %v46_v2, 0.999999  ;;  %v49_v7 = vmin.f32 %v47_v3, 0.999999 }
  0x10   :  { %v74_v17 = vmul.f32 0.75, %v72_v8  ;;  %v75_v19 = vmul.f32 0.75, %v73_v11 }
  0x11   :  { %v52_v9 = vsub.f32 1.0, %v48_v6  ;;  %v53_v10 = vsub.f32 1.0, %v49_v7  ;;  %107 = vlog2.f32 %v48_v6  ;;  %v64_v16 = vmul.f32 %v48_v6, %v48_v6 }
  0x12   :  { %109 = vlog2.f32 %v49_v7  ;;  %v65_v18 = vmul.f32 %v49_v7, %v49_v7 }
  0x13   :  { %111 = vlog2.f32 %v52_v9  ;;  %v62_v13 = vmul.f32 %v52_v9, %v52_v9  ;;  %v63_v14 = vmul.f32 %v53_v10, %v53_v10  ;;  %v76_v25 = vmul.f32 %v74_v17, %v64_v16 }
  0x14   :  { %113 = vlog2.f32 %v53_v10  ;;  %v77_v28 = vmul.f32 %v75_v19, %v65_v18 }
  0x15   :  { %v68_v20 = vmul.f32 %v66_v12, %v62_v13  ;;  %v69_v22 = vmul.f32 %v67_v15, %v63_v14 }
  0x17   :  { %v108_v21 = vpop.eup %107 }
  0x18   :  { %v110_v23 = vpop.eup %109  ;;  %v55_v24 = vmul.f32 0.6931472, %v108_v21 }
  0x19   :  { %v112_v26 = vpop.eup %111  ;;  %v57_v27 = vmul.f32 0.6931472, %v110_v23 }
  0x1a   :  { %v114_v29 = vpop.eup %113  ;;  %v59_v30 = vmul.f32 0.6931472, %v112_v26  ;;  %v70_v31 = vmul.f32 %v68_v20, %v55_v24 }
  0x1b   :  { %v61_v32 = vmul.f32 0.6931472, %v114_v29  ;;  %v71_v33 = vmul.f32 %v69_v22, %v57_v27 }
  0x1c   :  { %v78_v34 = vmul.f32 %v76_v25, %v59_v30 }
  0x1d   :  { %v79_v35 = vmul.f32 %v77_v28, %v61_v32 }
  0x1e   :  { %v80_v36 = vsub.f32 %v70_v31, %v78_v34 }
  0x1f   :  { %v81_v37 = vsub.f32 %v71_v33, %v79_v35 }
  0x21   :  { %v82_v38 = vadd.f32 %v81_v37, %v80_v36 }
  0x23   :  { %83 = vst [vmem:[#allocation7] sm:$0xff] %v82_v38 }
  0x24   :  { %94 = dma.vmem_to_hbm [thread:$0]  %s90_s1, 128, %s92_s23, [#allocation4]  }
  0x25   :  { %191 = dma.done.wait [#allocation4], 128  }
  0x26   :  { %192 = vsyncadd [#allocation4], 4294967168 }
  0x27   :  { %99 = vsyncpa [#allocation3], 1 }
  0x28   :  { %100 = vsyncpa [#allocation6], 1 }
  0x29   :  { %101 = vsyncpa [#allocation4], 1 }

</bundles_post_ra>
